<compile_context>
chip_gen: v5e
topology: v5e:2x2
jax: 0.10.0
libtpu: 0.0.40
codegen_flags: <defaults>
</compile_context>

<pallas_src>
import functools

import jax
import jax.numpy as jnp
from jax.experimental import pallas as pl
from jax.experimental.pallas import tpu as pltpu


def _se_kernel(x_ref, w1_ref, w2_ref, o_ref, *, inv_hw):
    # x_ref/o_ref: (TB, C, HWp)   w1_ref: (C, Cr)   w2_ref: (Cr, C)
    x = x_ref[...]                                           # keep input dtype

    # --- squeeze: global average pool over (possibly zero-padded) spatial ---
    # f32 accumulation; divide by the TRUE HW so padding does not bias the mean.
    s = jnp.sum(x, axis=2, dtype=jnp.float32) * jnp.float32(inv_hw)   # (TB, C)

    # --- excitation: FC -> ReLU -> FC -> Sigmoid (tiny, f32) ---
    h = jnp.dot(s, w1_ref[...].astype(jnp.float32),
                preferred_element_type=jnp.float32)                   # (TB, Cr)
    h = jnp.maximum(h, 0.0)
    y = jnp.dot(h, w2_ref[...].astype(jnp.float32),
                preferred_element_type=jnp.float32)                   # (TB, C)
    y = jax.nn.sigmoid(y)

    # --- scale: big elementwise multiply in the input dtype ---
    o_ref[...] = (x * y.astype(x.dtype)[:, :, None]).astype(o_ref.dtype)


def _vmem_budget_bytes():
    """Scoped-VMEM limit that is safe on v5e/v6e (128 MiB) and v7x (64 MiB/TC)."""
    try:
        phys = int(pltpu.get_tpu_info().vmem_capacity_bytes)
    except Exception:
        phys = 64 * 1024 * 1024          # conservative fallback: v7x per-TC VMEM
    return min((phys * 3) // 4, 100 * 1024 * 1024)


def se_layer(x, w1, w2):
    """SE layer forward.  x: (B, C, H, W).  w1: (C, C//r).  w2: (C//r, C)."""
    B, C, H, W = x.shape
    HW = H * W
    Cr = w1.shape[1]
    dtype_bytes = jnp.dtype(x.dtype).itemsize

    # Lane-dense output: pad HW to a multiple of 128 when the extra HBM bytes
    # are modest (<= ~50%).  Masked partial stores are the biggest store-path
    # penalty, but this kernel is bandwidth-bound, so huge padding (e.g. 49->128)
    # would cost more than it saves.
    HWp = ((HW + 127) // 128) * 128
    if HW % 128 != 0 and (HWp - HW) * 2 > HW:
        HWp = HW                                   # padding overhead too large

    x_flat = x.reshape(B, C, HW)
    if HWp != HW:
        x_flat = jnp.pad(x_flat, ((0, 0), (0, 0), (0, HWp - HW)))

    # Batch tile TB: fill most of VMEM with the double-buffered in+out blocks
    # (~4 * TB * C * HWp * bytes), but keep >= 2 grid steps for v7x megacore.
    vmem_limit = _vmem_budget_bytes()
    block_budget = vmem_limit - 4 * 1024 * 1024    # headroom: weights + scratch
    per_img = C * HWp * dtype_bytes
    # TODO(synk): very large single images (C*HWp*bytes > budget/4) would need
    # an additional spatial tiling pass; not needed for typical SE shapes.
    tb = max(1, block_budget // (4 * per_img))
    tb = int(min(tb, B))
    if B > 1:
        tb = int(min(tb, int(pl.cdiv(B, 2))))      # keep >= 2 grid steps

    # Pad batch to a multiple of TB; zero images are harmless (0 * scale = 0)
    # and are sliced off below.
    num_blocks = int(pl.cdiv(B, tb))
    Bp = num_blocks * tb
    if Bp != B:
        x_flat = jnp.pad(x_flat, ((0, Bp - B), (0, 0), (0, 0)))

    kernel = functools.partial(_se_kernel, inv_hw=1.0 / float(HW))

    out_flat = pl.pallas_call(
        kernel,
        out_shape=jax.ShapeDtypeStruct((Bp, C, HWp), x.dtype),
        grid_spec=pltpu.PrefetchScalarGridSpec(
            num_scalar_prefetch=0,
            grid=(num_blocks,),
            in_specs=[
                pl.BlockSpec((tb, C, HWp), lambda b: (b, 0, 0)),
                pl.BlockSpec((C, Cr), lambda b: (0, 0)),
                pl.BlockSpec((Cr, C), lambda b: (0, 0)),
            ],
            out_specs=pl.BlockSpec((tb, C, HWp), lambda b: (b, 0, 0)),
        ),
        compiler_params=pltpu.CompilerParams(
            dimension_semantics=("parallel",),
            vmem_limit_bytes=int(vmem_limit),
        ),
    )(x_flat, w1, w2)

    return out_flat[:B, :, :HW].reshape(B, C, H, W)


def se_layer_ref(x, w1, w2):
    """Pure-JAX reference matching the PyTorch forward."""
    y = jnp.mean(x, axis=(2, 3))                 # (B, C)
    y = jnp.maximum(y @ w1, 0.0)                 # (B, Cr)
    y = jax.nn.sigmoid(y @ w2)                   # (B, C)
    return x * y[:, :, None, None]


if __name__ == "__main__":
    key = jax.random.PRNGKey(0)

    # Case 1: channel=32, reduction=16 (module default) -> hidden=2, 8x8 spatial.
    B, C, H, W = 2, 32, 8, 8
    Cr = C // 16
    kx, k1, k2, key = jax.random.split(key, 4)
    x = jax.random.normal(kx, (B, C, H, W), dtype=jnp.float32)
    # nn.Linear(C, Cr, bias=False).weight is (Cr, C); store its transpose so the
    # kernel computes s @ w1 directly.  Same for the second FC.
    w1 = jax.random.normal(k1, (C, Cr), dtype=jnp.float32) * 0.1
    w2 = jax.random.normal(k2, (Cr, C), dtype=jnp.float32) * 0.1

    out = se_layer(x, w1, w2)
    jax.block_until_ready(out)
    ref = se_layer_ref(x, w1, w2)
    assert out.shape == (B, C, H, W)
    assert jnp.allclose(out, ref, atol=1e-5, rtol=1e-5), "mismatch vs reference (case 1)"

    # Case 2: odd batch + 14x14 spatial -> exercises batch padding and the
    # lane-dense HW padding (196 -> 256) with sum/true_HW correction.
    B2, C2, H2, W2 = 3, 32, 14, 14
    Cr2 = C2 // 16
    kx2, k12, k22, key = jax.random.split(key, 4)
    x2 = jax.random.normal(kx2, (B2, C2, H2, W2), dtype=jnp.float32)
    w12 = jax.random.normal(k12, (C2, Cr2), dtype=jnp.float32) * 0.1
    w22 = jax.random.normal(k22, (Cr2, C2), dtype=jnp.float32) * 0.1

    out2 = se_layer(x2, w12, w22)
    jax.block_until_ready(out2)
    ref2 = se_layer_ref(x2, w12, w22)
    assert out2.shape == (B2, C2, H2, W2)
    assert jnp.allclose(out2, ref2, atol=1e-5, rtol=1e-5), "mismatch vs reference (case 2)"

    print("KERNEL_OK")
</pallas_src>

<mosaic_0001>
module attributes {stable_mosaic.version = 11 : i64} {
  func.func @_se_kernel(%arg0: i32, %arg1: memref<1x32x64xf32, #tpu.memory_space<vmem>>, %arg2: memref<32x2xf32, #tpu.memory_space<vmem>>, %arg3: memref<2x32xf32, #tpu.memory_space<vmem>>, %arg4: memref<1x32x64xf32, #tpu.memory_space<vmem>>) attributes {dimension_semantics = [#tpu.dimension_semantics<parallel>], iteration_bounds = array<i64: 2>, scalar_prefetch = 0 : i64, scratch_operands = 0 : i64, tpu.core_type = #tpu.core_type<tc>, window_params = [{transform_indices = @transform_0, window_bounds = array<i64: 1, 32, 64>}, {pipeline_mode = #tpu.pipeline_mode<synchronous>, transform_indices = @transform_1, window_bounds = array<i64: 32, 2>}, {pipeline_mode = #tpu.pipeline_mode<synchronous>, transform_indices = @transform_2, window_bounds = array<i64: 2, 32>}, {transform_indices = @transform_3, window_bounds = array<i64: 1, 32, 64>}]} {
    %c0 = arith.constant 0 : index
    %c0_0 = arith.constant 0 : index
    %c0_1 = arith.constant 0 : index
    %0 = vector.load %arg1[%c0, %c0_0, %c0_1] : memref<1x32x64xf32, #tpu.memory_space<vmem>>, vector<1x32x64xf32>
    %cst = arith.constant dense<0.000000e+00> : vector<1x32xf32>
    %1 = vector.multi_reduction <add>, %0, %cst [2] : vector<1x32x64xf32> to vector<1x32xf32>
    %cst_2 = arith.constant 1.562500e-02 : f32
    %2 = vector.broadcast %cst_2 : f32 to vector<1x32xf32>
    %3 = arith.mulf %1, %2 : vector<1x32xf32>
    %c0_3 = arith.constant 0 : index
    %c0_4 = arith.constant 0 : index
    %4 = vector.load %arg2[%c0_3, %c0_4] : memref<32x2xf32, #tpu.memory_space<vmem>>, vector<32x2xf32>
    %cst_5 = arith.constant dense<0.000000e+00> : vector<1x2xf32>
    %5 = tpu.matmul %3, %4, %cst_5 {dimension_numbers = #tpu.dot_dimension_numbers<[1], [0], [0], [1], [0, 0, 1, 1], [], []>} : vector<1x32xf32>, vector<32x2xf32>, vector<1x2xf32> -> vector<1x2xf32>
    %cst_6 = arith.constant 0.000000e+00 : f32
    %6 = vector.broadcast %cst_6 : f32 to vector<1x2xf32>
    %7 = arith.maximumf %5, %6 : vector<1x2xf32>
    %c0_7 = arith.constant 0 : index
    %c0_8 = arith.constant 0 : index
    %8 = vector.load %arg3[%c0_7, %c0_8] : memref<2x32xf32, #tpu.memory_space<vmem>>, vector<2x32xf32>
    %cst_9 = arith.constant dense<0.000000e+00> : vector<1x32xf32>
    %9 = tpu.matmul %7, %8, %cst_9 {dimension_numbers = #tpu.dot_dimension_numbers<[1], [0], [0], [1], [0, 0, 1, 1], [], []>} : vector<1x2xf32>, vector<2x32xf32>, vector<1x32xf32> -> vector<1x32xf32>
    %10 = arith.negf %9 : vector<1x32xf32>
    %11 = math.exp %10 : vector<1x32xf32>
    %cst_10 = arith.constant 1.000000e+00 : f32
    %12 = vector.broadcast %cst_10 : f32 to vector<1x32xf32>
    %13 = arith.addf %12, %11 : vector<1x32xf32>
    %14 = arith.divf %12, %13 : vector<1x32xf32>
    %15 = vector.shape_cast %14 : vector<1x32xf32> to vector<1x32x1xf32>
    %16 = vector.broadcast %15 : vector<1x32x1xf32> to vector<1x32x64xf32>
    %17 = arith.mulf %0, %16 : vector<1x32x64xf32>
    %c0_11 = arith.constant 0 : index
    %c0_12 = arith.constant 0 : index
    %c0_13 = arith.constant 0 : index
    %18 = vector.load %arg4[%c0_11, %c0_12, %c0_13] : memref<1x32x64xf32, #tpu.memory_space<vmem>>, vector<1x32x64xf32>
    tpu.vector_store %arg4[%c0_11, %c0_12, %c0_13], %17 {strides = array<i32>} : memref<1x32x64xf32, #tpu.memory_space<vmem>>, vector<1x32x64xf32>,
    return
  }
  func.func @transform_0(%arg0: i32) -> (i32, i32, i32) {
    %c0_i32 = arith.constant 0 : i32
    %c0_i32_0 = arith.constant 0 : i32
    %c0_i32_1 = arith.constant 0 : i32
    return %arg0, %c0_i32, %c0_i32_0 : i32, i32, i32
  }
  func.func @transform_1(%arg0: i32) -> (i32, i32) {
    %c0_i32 = arith.constant 0 : i32
    %c0_i32_0 = arith.constant 0 : i32
    %c0_i32_1 = arith.constant 0 : i32
    return %c0_i32, %c0_i32_0 : i32, i32
  }
  func.func @transform_2(%arg0: i32) -> (i32, i32) {
    %c0_i32 = arith.constant 0 : i32
    %c0_i32_0 = arith.constant 0 : i32
    %c0_i32_1 = arith.constant 0 : i32
    return %c0_i32, %c0_i32_0 : i32, i32
  }
  func.func @transform_3(%arg0: i32) -> (i32, i32, i32) {
    %c0_i32 = arith.constant 0 : i32
    %c0_i32_0 = arith.constant 0 : i32
    %c0_i32_1 = arith.constant 0 : i32
    return %arg0, %c0_i32, %c0_i32_0 : i32, i32, i32
  }
}

</mosaic_0001>

<bundles_post_ra>
// kernel: tpu_custom_call.1
= control target key start
LH: loop header
LB: loop body
LE: loop exit
PB: predicated region body
PF: predicated region fallthrough
CT: control target
= control target key end

     0   :  { %8 = vsyncpa [#allocation3], 0  ;;  %s800_s0 = inlined_call_operand.hbm [shape: f32[2,32,64], index: 0, kind: input, shape index: {}]   ;;  %s801_s1 = inlined_call_operand.vmem [shape: f32[32,2], index: 1, kind: input, shape index: {}]   ;;  %s802_s2 = inlined_call_operand.vmem [shape: f32[2,32], index: 2, kind: input, shape index: {}]   ;;  %s803_s3 = inlined_call_operand.hbm [shape: f32[2,32,64], index: 3, kind: output, shape index: {}]  }
   0x1   :  { %10 = vsyncpa [#allocation3 + $0x1], 0 }
   0x2   :  { %11 = vsyncpa [#allocation4], 0 }
   0x3   :  { %13 = vsyncpa [#allocation4 + $0x1], 0  ;;  %s630_s12 = smov 0   ;;  %s632_s13 = smov 0  }
   0x4   :  { %s634_s14 = smov 0   ;;  %s636_s15 = smov 0  }
   0x5 LB: > { %s651_s16 = sadd.s32 4294967295, %s604_s15   ;;  %s429_s17 = sadd.s32 4294967294, %s604_s15   ;;  %s604_s15 = sphi %s636_s15, %s813_s15   ;;  %s600_s14 = sphi %s634_s14, %s812_s14   ;;  %s596_s13 = sphi %s632_s13, %s811_s13   ;;  %s592_s12 = sphi %s630_s12, %s810_s12  }
   0x6   : > { %s655_s18 = sadd.s32 1, %s604_s15   ;;  %s26_s19 = sadd.s32 1, %s600_s14 }
   0x7   : > { %s23_s20 = ssub.s32 %s604_s15, %s655_s18  ;;  %p33_p0 = scmp.ne.s32.totalorder %s600_s14, %s596_s13 }
   0x8   : > { %p24_p1 = scmp.eq.s32.totalorder %s23_s20, 0  ;;  %p34_p2 = scmp.eq.s32.totalorder %s604_s15, 0 }
   0x9   : > { %p39_p3 = scmp.ne.s32.totalorder %s596_s13, %s592_s12  ;;  %p40_p4 = scmp.eq.s32.totalorder %s651_s16, 0 }
   0xa   : > { %s667_s21 = scalar_select %p24_p1, %s600_s14, %s26_s19  }
   0xb   : > { %p669_p5 = por %p34_p2, %p33_p0  ;;  %p673_p6 = por %p40_p4, %p39_p3 }
   0xc   : > { %p105_p7 = scmp.eq.s32.totalorder %s651_s16, 1  ;;  %p111_p8 = scmp.eq.s32.totalorder %s429_s17, 1 }
   0xd   : > { %p461_p10 = scmp.lt.s32.totalorder %s604_s15, 2  ;;  %s137_s26 = sand.u32 1, %s600_s14  }
   0xe   : > { %p680_p11 = por %p105_p7, %p33_p0  ;;  %p684_p12 = por %p111_p8, %p39_p3 }
   0xf   : > { %s447_s27 = sshll.u32 %s604_s15, 5  ;;  %s432_s28 = sshll.u32 %s137_s26, 5 }
  0x10   : > { %s146_s4 = scalar_lea.hbm %s800_s0, %s447_s27  ;;  %s141_s6 = scalar_lea.vmem [#allocation2], %s432_s28 }
  0x11   : > { %s147_s5 = sshll.u32 %s146_s4, 4  ;;  %s149_s7 = sshll.u32 %s141_s6, 4  ;;  %s148_s5 = int_to_ptr.hbm [resolvable:$true] %s147_s5  ;;  %s150_s7 = int_to_ptr.vmem [resolvable:$true] %s149_s7 }
  0x12   : > { %p695_p13 = pnand %p461_p10, %p669_p5  ;;  %p435_p0 = scmp.ge.s32.totalorder %s604_s15, 1 }
  0x13   : > { %p157_p1 = scmp.lt.s32.totalorder %s604_s15, 3  ;;  %s138_s9 = scalar_lea.sflag [#allocation3], %s137_s26 }
  0x14   : > { %s508_s10 = sshra.s32 %s148_s5, 4  ;;  %p512_p3 = pneg %p695_p13  ;;  %s509_s10 = int_to_ptr.hbm [resolvable:$true] %s508_s10 }
  0x15   : > { %s510_s11 = scalar_lea.hbm %s509_s10, 32  ;;  %s515_s20 = scalar_lea.hbm %s800_s0, 64 }
  0x16   : > { %p511_p2 = scmp.ne.s32.totalorder %s509_s10, %s510_s11  ;;  %p516_p5 = scmp.lt.s32.totalorder %s509_s10, %s800_s0 }
  0x17   : > { %p517_p8 = scmp.lt.s32.totalorder %s515_s20, %s510_s11 }
  0x18   : > { %p513_p4 = pnand %p512_p3, %p511_p2 }
  0x19   : > { %p518_p10 = por %p517_p8, %p516_p5 }
  0x1a   : > { %p514_p7 = pneg %p513_p4 }
  0x1c   : > { %p519_p9 = pnand %p518_p10, %p514_p7 }
  0x1e   : > { %522 = shalt.err (!%p519_p9)
}
  0x1f   : > { %s606_s26 = smov 128   ;;  %s607_s28 = smov 8  }
  0x20   : > { %456 = dma.hbm_to_vmem [thread:$0]  (!%p695_p13), %s148_s5, 512, %s150_s7, %s138_s9, %s606_s26, %s606_s26, %s607_s28  }
  0x21   : > { %p158_p2 = pnand %p435_p0, %p157_p1 }
  0x22   : > { %s716_s29 = sand.u32 (!%p158_p2), 1, %s596_s13  }
  0x23   : > { %161 = sbr.rel (%p158_p2) target bundleno = 580 (0x244), region = 32  ;;  %s436_s30 = sshll.u32 (!%p158_p2), %s716_s29, 5 }
  0x24   : > { %s164_s4 = scalar_lea.sflag (!%p158_p2), [#allocation3], %s716_s29  ;;  %s167_s6 = scalar_lea.vmem (!%p158_p2), [#allocation2], %s436_s30 }
  0x28   : > { %583 = dma.done.wait (%p673_p6), %s164_s4, 512  }
  0x29   : > { %585 = vsyncadd (%p673_p6), %s164_s4, 4294966784  ;;  %vm195_vm0 = vcmask 523264   ;;  %v726_v0 = vld [vmem:[%s167_s6] sm:$0xff]  ;;  %v728_v1 = vld [vmem:[%s167_s6 + $0x10] sm:$0xff]  ;;  %v220_v12 = vlaneseq  ;;  %vm225_vm1 = vcmask 130112   ;;  %vm229_vm2 = vcmask 195712  }
  0x2a   : > { %v196_v2 = vsel %vm195_vm0, %v726_v0, 0.0  ;;  %v202_v3 = vsel %vm195_vm0, %v728_v1, 0.0  ;;  %v734_v4 = vld [vmem:[%s167_s6 + $0x8] sm:$0xff]  ;;  %v736_v5 = vld [vmem:[%s167_s6 + $0x18] sm:$0xff]  ;;  %v214_v9 = vld [vmem:[%s801_s1 + $0x10] sm:$0xff]  ;;  %vm233_vm3 = vcmask 261312  }
  0x2b   : > { %197 = vadd.xlane.f32.xlu0 %v196_v2  ;;  %203 = vadd.xlane.f32.xlu1 %v202_v3  ;;  %v199_v6 = vsel %vm195_vm0, %v734_v4, 0.0  ;;  %v205_v7 = vsel %vm195_vm0, %v736_v5, 0.0  ;;  %v215_v8 = vld [vmem:[%s801_s1 + $0x18] sm:$0xff]  ;;  %v213_v10 = vld [vmem:[%s801_s1 + $0x8] sm:$0xff]  ;;  %v212_v11 = vld [vmem:[%s801_s1] sm:$0xff]  ;;  %v221_v15 = vand.u32 127, %v220_v12 }
  0x2c   : > { %250 = vmatpush.msra.mxu0 %v215_v8  ;;  %vm235_vm4 = vcmask 261120   ;;  %v259_v32 = vld [vmem:[%s802_s2] sm:$0x3]  ;;  %vm264_vm5 = vcmask 1041408   ;;  %vm260_vm6 = vcmask 15360   ;;  %v309_v35 = vshrl.u32 %v220_v12, 7 }
  0x2d   : > { %v223_v17 = vadd.s32 4294967288, %v221_v15  ;;  %v231_v18 = vadd.s32 4294967272, %v221_v15  ;;  %v227_v19 = vadd.s32 4294967280, %v221_v15  ;;  %439 = vmatpush.msk.msra.mxu1 %vm264_vm5, %v259_v32  ;;  %s190_s22 = scalar_lea.vmem [#allocation5], %s436_s30  ;;  %s448_s27 = sshll.u32 %s651_s16, 5 }
  0x2e   : > { %251 = vmatpush.msra.mxu0 %v214_v9  ;;  %499 = vset.pattern.permute.xlu2 %v309_v35  ;;  %v328_v36 = vadd.s32 24, %v309_v35  ;;  %v322_v37 = vadd.s32 16, %v309_v35  ;;  %v316_v53 = vadd.s32 8, %v309_v35  ;;  %s352_s4 = scalar_lea.hbm %s803_s3, %s448_s27  ;;  %s353_s6 = sshll.u32 %s190_s22, 4  ;;  %s354_s6 = int_to_ptr.vmem [resolvable:$true] %s353_s6 }
  0x2f   : > { %s355_s23 = sshll.u32 %s352_s4, 4  ;;  %s341_s16 = scalar_lea.sflag [#allocation4], %s716_s29  ;;  %s356_s23 = int_to_ptr.hbm [resolvable:$true] %s355_s23 }
  0x30   : > { %252 = vmatpush.msra.mxu0 %v213_v10  ;;  %502 = vset.pattern.permute.xlu1 %v328_v36  ;;  %s552_s30 = sshra.s32 %s356_s23, 4  ;;  %s558_s9 = scalar_lea.hbm %s803_s3, 64  ;;  %s553_s30 = int_to_ptr.hbm [resolvable:$true] %s552_s30 }
  0x31   : > { %501 = vset.pattern.permute.xlu0 %v322_v37  ;;  %s554_s5 = scalar_lea.hbm %s553_s30, 32  ;;  %p559_p0 = scmp.lt.s32.totalorder %s553_s30, %s803_s3 }
  0x32   : > { %253 = vmatpush.msra.mxu0 %v212_v11  ;;  %p555_p6 = scmp.ne.s32.totalorder %s553_s30, %s554_s5  ;;  %p560_p1 = scmp.lt.s32.totalorder %s558_s9, %s554_s5 }
  0x33   : > { %200 = vadd.xlane.f32.xlu0 %v199_v6  ;;  %206 = vadd.xlane.f32.xlu1 %v205_v7 }
  0x34   : > { %p556_p9 = pnand %p555_p6, %p680_p11  ;;  %p561_p3 = por %p560_p1, %p559_p0 }
  0x36   : > { %p557_p13 = pneg %p556_p9 }
  0x38   : > { %p562_p4 = pnand %p561_p3, %p557_p13 }
  0x9e   : > { %v198_v13 = vpop.xlane.xlu0 %197  ;;  %v204_v14 = vpop.xlane.xlu1 %203 }
  0x9f   : > { %v208_v16 = vmul.f32 0.015625, %v198_v13  ;;  %v210_v20 = vmul.f32 0.015625, %v204_v14 }
  0xa1   : > { %v222_v25 = vperm.slane %v208_v16, %v221_v15  ;;  %v228_v28 = vperm.slane %v210_v20, %v227_v19 }
  0xa6   : > { %v201_v21 = vpop.xlane.xlu0 %200  ;;  %v207_v22 = vpop.xlane.xlu1 %206 }
  0xa7   : > { %v209_v23 = vmul.f32 0.015625, %v201_v21  ;;  %v211_v24 = vmul.f32 0.015625, %v207_v22 }
  0xa9   : > { %v224_v26 = vperm.slane %v209_v23, %v223_v17  ;;  %v232_v27 = vperm.slane %v211_v24, %v231_v18 }
  0xab   : > { %v226_v29 = vsel %vm225_vm1, %v224_v26, %v222_v25 }
  0xac   : > { %v230_v30 = vsel %vm229_vm2, %v228_v28, %v226_v29 }
  0xad   : > { %v234_v31 = vsel %vm233_vm3, %v232_v27, %v230_v30 }
  0xae   : > { %438 = vmatmul.msk.f32.vlgmr.msra.gmra.mxu0 %vm235_vm4, %v234_v31 }
 0x12b   : > { %v255_v33 = vpop.f32.mrf.mxu0 }
 0x12c   : > { %v258_v34 = vmax.f32 %v255_v33, 0.0 }
 0x12e   : > { %440 = vmatmul.msk.f32.vlgmr.msra.gmra.mxu1 %vm260_vm6, %v258_v34 }
 0x1ab   : > { %v285_v38 = vpop.f32.mrf.mxu1 }
 0x1ac   : > { %v441_v39 = vmul.f32 -1.442695, %v285_v38 }
 0x1ae   : > { %504 = vpow2.f32 %v441_v39 }
 0x1b4   : > { %v505_v40 = vpop.eup %504 }
 0x1b5   : > { %v291_v41 = vadd.f32 1.0, %v505_v40 }
 0x1b7   : > { %506 = vrcp.f32 %v291_v41  ;;  %v303_v45 = vand.u32 2147483648, %v291_v41  ;;  %v301_v47 = vand.u32 2147483647, %v291_v41  ;;  %vm297_vm8 = vweird.f32 %v291_v41 }
 0x1b9   : > { %v304_v49 = vor.u32 1.1754944e-38, %v303_v45  ;;  %vm302_vm10 = vcmp.eq.f32.partialorder %v301_v47, 8.507059e+37 }
 0x1bd   : > { %v507_v42 = vpop.eup %506 }
 0x1be   : > { %v293_v43 = vmul.f32 %v507_v42, %v291_v41  ;;  %vm298_vm7 = vweird.f32 %v507_v42 }
 0x1bf   : > { %vm299_vm9 = vmor %vm297_vm8, %vm298_vm7 }
 0x1c0   : > { %v294_v44 = vsub.f32 1.0, %v293_v43 }
 0x1c2   : > { %v295_v46 = vmul.f32 %v507_v42, %v294_v44 }
 0x1c4   : > { %v296_v48 = vadd.f32 %v507_v42, %v295_v46 }
 0x1c6   : > { %v300_v50 = vsel %vm299_vm9, %v507_v42, %v296_v48 }
 0x1c7   : > { %v305_v51 = vsel %vm302_vm10, %v304_v49, %v300_v50 }
 0x1c8   : > { %v307_v52 = vperm.slane %v305_v51, 0 }
 0x1ca   : > { %330 = vperm.xlu1 %502, %v307_v52   ;;  %324 = vperm.xlu0 %501, %v307_v52  }
 0x1cb   : > { %312 = vperm.xlu2 %499, %v307_v52  }
 0x1d2   : > { %503 = vset.pattern.permute.xlu0 %v328_v36 }
 0x1d3   : > { %500 = vset.pattern.permute.xlu2 %v316_v53 }
 0x1db   : > { %318 = vperm.xlu2 %500, %v307_v52  }
 0x225   : > { %v313_v54 = vpop.permute.xlu2 %312 }
 0x226   : > { %v332_v55 = vmul.f32 %v313_v54, %v726_v0 }
 0x228   : > { %336 = vst.msk [vmem:[%s190_s22] sm:$0xff] %vm195_vm0, %v332_v55 }
 0x235   : > { %v319_v56 = vpop.permute.xlu2 %318 }
 0x236   : > { %v333_v57 = vmul.f32 %v319_v56, %v734_v4 }
 0x238   : > { %337 = vst.msk [vmem:[%s190_s22 + $0x8] sm:$0xff] %vm195_vm0, %v333_v57 }
 0x23c   : > { %v331_v58 = vpop.permute.xlu1 %330  ;;  %v325_v59 = vpop.permute.xlu0 %324 }
 0x23d   : > { %v335_v60 = vmul.f32 %v331_v58, %v736_v5  ;;  %v334_v61 = vmul.f32 %v325_v59, %v728_v1 }
 0x23f   : > { %339 = vst.msk [vmem:[%s190_s22 + $0x18] sm:$0xff] %vm195_vm0, %v335_v60 }
 0x240   : > { %338 = vst.msk [vmem:[%s190_s22 + $0x10] sm:$0xff] %vm195_vm0, %v334_v61 }
 0x241   : > { %565 = shalt.err (!%p562_p4)
}
 0x242   : > { %s608_s29 = smov 128   ;;  %s609_s17 = smov 8  }
 0x243   : > { %451 = dma.vmem_to_hbm [thread:$0]  (%p680_p11), %s354_s6, 512, %s356_s23, %s341_s16, %s608_s29, %s608_s29, %s609_s17  }
 0x244 PF: > { %s370_s19 = sand.u32 1, %s592_s12   ;;  %p809_p7 = scmp.ge.s32.totalorder %s604_s15, 2 }
 0x245   : > { %s371_s20 = scalar_lea.sflag [#allocation4], %s370_s19 }
 0x246   : > { %p458_p5 = pnand %p809_p7, %p684_p12 }
 0x248   : > { %p459_p8 = pneg %p458_p5 }
 0x24a   : > { %587 = dma.done.wait (%p459_p8), %s371_s20, 512  }
 0x24b   : > { %589 = vsyncadd (%p459_p8), %s371_s20, 4294966784  ;;  %p16_p10 = scmp.ge.s32.totalorder %s655_s18, 4   ;;  %s810_s12 = smov %s596_s13 }
 0x24c   : > { %s811_s13 = smov %s600_s14  ;;  %s812_s14 = smov %s667_s21 }
 0x24d   : > { %s813_s15 = smov %s655_s18  ;;  %18 = sbr.rel (!%p16_p10) target bundleno = 5 (0x5), region = 77 }
 0x252   :  { %377 = vsyncpa [#allocation3], 1 }
 0x253   :  { %379 = vsyncpa [#allocation3 + $0x1], 1 }
 0x254   :  { %380 = vsyncpa [#allocation4], 1 }
 0x255   :  { %382 = vsyncpa [#allocation4 + $0x1], 1 }

</bundles_post_ra>
